<compile_context>
chip_gen: v7x
topology: tpu7x:2x2x1
jax: 0.10.0
libtpu: 0.0.40
codegen_flags: <defaults>
</compile_context>

<pallas_src>
import functools

import jax
import jax.numpy as jnp
from jax.experimental import pallas as pl
from jax.experimental.pallas import tpu as pltpu


# --------------------------------------------------------------------------
# Fast path kernel: logits laid out as (N, C, rows, 128).
# --------------------------------------------------------------------------
def _mtl_kernel_rows(x_ref, t_ref, out_ref, *, c_total, ts, j_inner,
                     rows_total, num_full_tiles, needs_mask):
    """One grid step: (1, C, TS, 128) logits + (1, 1, TS, 128) targets.

    Accumulates sum(log p_target) over the tile into out_ref (1,1,1,1), which is
    resident across the innermost (spatial reduction) grid axis.
    """
    j = pl.program_id(2)

    @pl.when(j == 0)
    def _():
        out_ref[...] = jnp.zeros_like(out_ref)

    # TODO(synk): out-of-range targets (e.g. ignore_index 255 / -1) silently
    # contribute logpt = -lse and still count in the mean; PyTorch's gather
    # would error instead.
    tgt = t_ref[0, 0].astype(jnp.int32)                     # (TS, 128)

    # Running max over classes (unrolled; stays in the input dtype -> VPU).
    m = x_ref[0, 0]
    for c in range(1, c_total):
        m = jnp.maximum(m, x_ref[0, c])

    # Running sum of exp (f32 on the EUP) + one-hot gather of the shifted
    # target logit (only one nonzero addend per pixel, so input-dtype adds are
    # exact; a single upcast at the end).
    sum_exp = jnp.zeros(m.shape, jnp.float32)
    s_t = jnp.zeros(m.shape, m.dtype)
    for c in range(c_total):
        s_c = x_ref[0, c] - m                               # input dtype
        sum_exp = sum_exp + jnp.exp(s_c.astype(jnp.float32))
        s_t = s_t + jnp.where(tgt == c, s_c, jnp.zeros((), m.dtype))

    logpt = s_t.astype(jnp.float32) - jnp.log(sum_exp)      # (TS, 128) f32

    tile_idx = pl.program_id(1) * j_inner + j

    if needs_mask:
        # Full tiles: cheap unmasked accumulate.
        @pl.when(tile_idx < num_full_tiles)
        def _():
            out_ref[...] += jnp.sum(logpt).reshape(1, 1, 1, 1)

        # Partial / padded tiles: mask rows past the spatial extent (select also
        # stops any NaN/inf coming from stale VMEM in padded rows).
        @pl.when(tile_idx >= num_full_tiles)
        def _():
            row = tile_idx * ts + jax.lax.broadcasted_iota(jnp.int32, logpt.shape, 0)
            masked = jnp.where(row < rows_total, logpt, 0.0)
            out_ref[...] += jnp.sum(masked).reshape(1, 1, 1, 1)
    else:
        out_ref[...] += jnp.sum(logpt).reshape(1, 1, 1, 1)


# --------------------------------------------------------------------------
# Fallback kernel: logits laid out as (N, C, L); softmax across sublanes.
# --------------------------------------------------------------------------
def _mtl_kernel_lanes(x_ref, t_ref, out_ref, *, l_total, tl, needs_mask):
    j = pl.program_id(1)

    @pl.when(j == 0)
    def _():
        out_ref[...] = jnp.zeros_like(out_ref)

    x = x_ref[0].astype(jnp.float32)                        # (C, TL)
    tgt = t_ref[0].astype(jnp.int32)                        # (1, TL)

    m = jnp.max(x, axis=0, keepdims=True)
    s = x - m
    lse = jnp.log(jnp.sum(jnp.exp(s), axis=0, keepdims=True))
    cls = jax.lax.broadcasted_iota(jnp.int32, x.shape, 0)
    s_t = jnp.sum(jnp.where(cls == tgt, s, 0.0), axis=0, keepdims=True)
    logpt = s_t - lse                                       # (1, TL)

    if needs_mask:
        last = pl.num_programs(1) - 1

        @pl.when(j < last)
        def _():
            out_ref[...] += jnp.sum(logpt).reshape(1, 1, 1)

        @pl.when(j == last)
        def _():
            col = j * tl + jax.lax.broadcasted_iota(jnp.int32, logpt.shape, 1)
            out_ref[...] += jnp.sum(jnp.where(col < l_total, logpt, 0.0)).reshape(1, 1, 1)
    else:
        out_ref[...] += jnp.sum(logpt).reshape(1, 1, 1)


# --------------------------------------------------------------------------
# Tile-size helpers.
# --------------------------------------------------------------------------
def _pick_rows(rows, c, itemsize, max_block_bytes):
    """Rows-per-tile for the (rows, 128) layout: multiple of 8 (or full extent)."""
    row_bytes = c * 128 * itemsize
    ts = max(1, max_block_bytes // row_bytes)
    if ts >= rows:
        return rows                          # full extent (allowed by (8,128) rule)
    return min(rows, max(8, (ts // 8) * 8))  # multiple of 8; last tile masked


def _pick_lanes(l_total, c, itemsize, max_block_bytes):
    """Lane-tile width for the fallback path: multiple of 128 (or full extent)."""
    cols = max_block_bytes // max(1, c * itemsize)
    cols = max(128, (cols // 128) * 128)
    if cols >= l_total:
        return l_total
    return cols


_MAX_UNROLLED_CLASSES = 32   # beyond this, class-unrolling stops paying off


def mtl_loss(logits_nchw, target, tau, *, max_block_bytes=2 * 1024 * 1024):
    """Pallas implementation of MTL.forward(input, target, tau) with module
    defaults (normalized=False, reduction='mean', alpha=None, C > 1)."""
    N, C, H, W = logits_nchw.shape
    L = H * W
    M = N * L

    if C < 2:
        # TODO(synk): C==1 binary (logsigmoid) branch not implemented.
        raise NotImplementedError("MTL Pallas kernel implements the C>1 softmax branch only.")

    # Keep the stored integer width for targets (no extra HBM astype pass);
    # the int32 cast happens on the small VMEM tile inside the kernel.
    if (not jnp.issubdtype(target.dtype, jnp.integer)) or jnp.dtype(target.dtype).itemsize > 4:
        target = target.astype(jnp.int32)

    itemsize = jnp.dtype(logits_nchw.dtype).itemsize
    vmem_limit = 48 * 1024 * 1024   # fits the v7x 64 MiB core with headroom

    if L % 128 == 0 and C <= _MAX_UNROLLED_CLASSES:
        # ---- fast path: spatial axis viewed as (rows, 128); free reshapes ----
        rows = L // 128
        x = logits_nchw.reshape(N, C, rows, 128)
        t = target.reshape(N, 1, rows, 128)

        ts = _pick_rows(rows, C, itemsize, max_block_bytes)
        num_tiles = pl.cdiv(rows, ts)
        # v7x has 2 TensorCores: when the batch axis can't feed both, split the
        # spatial axis into a second parallel axis (no-op on v5e/v6e).
        p_split = 1 if N >= 2 else min(2, num_tiles)
        j_inner = pl.cdiv(num_tiles, p_split)
        needs_mask = (p_split * j_inner * ts) != rows
        num_full_tiles = rows // ts

        def tile_map(n, p, j):
            t_idx = jnp.minimum(p * j_inner + j, num_tiles - 1)  # clamp padded steps
            return (n, 0, t_idx, 0)

        partials = pl.pallas_call(
            functools.partial(_mtl_kernel_rows, c_total=C, ts=ts, j_inner=j_inner,
                              rows_total=rows, num_full_tiles=num_full_tiles,
                              needs_mask=needs_mask),
            out_shape=jax.ShapeDtypeStruct((N, p_split, 1, 1), jnp.float32),
            grid_spec=pltpu.PrefetchScalarGridSpec(
                num_scalar_prefetch=0,
                grid=(N, p_split, j_inner),
                in_specs=[
                    pl.BlockSpec((1, C, ts, 128), tile_map),     # logits
                    pl.BlockSpec((1, 1, ts, 128), tile_map),     # targets
                ],
                out_specs=pl.BlockSpec((1, 1, 1, 1), lambda n, p, j: (n, p, 0, 0)),
            ),
            compiler_params=pltpu.CompilerParams(
                dimension_semantics=("parallel", "parallel", "arbitrary"),
                vmem_limit_bytes=vmem_limit,
            ),
        )(x, t)
    else:
        # ---- fallback: lane-dense (1, C, TL) tiles, softmax across sublanes ----
        x = logits_nchw.reshape(N, C, L)
        t = target.reshape(N, 1, L)

        tl = _pick_lanes(L, C, itemsize, max_block_bytes)
        gj = pl.cdiv(L, tl)
        needs_mask = (L % tl) != 0

        partials = pl.pallas_call(
            functools.partial(_mtl_kernel_lanes, l_total=L, tl=tl, needs_mask=needs_mask),
            out_shape=jax.ShapeDtypeStruct((N, 1, 1), jnp.float32),
            grid_spec=pltpu.PrefetchScalarGridSpec(
                num_scalar_prefetch=0,
                grid=(N, gj),
                in_specs=[
                    pl.BlockSpec((1, C, tl), lambda n, j: (n, 0, j)),
                    pl.BlockSpec((1, 1, tl), lambda n, j: (n, 0, j)),
                ],
                out_specs=pl.BlockSpec((1, 1, 1), lambda n, j: (n, 0, 0)),
            ),
            compiler_params=pltpu.CompilerParams(
                dimension_semantics=("parallel", "arbitrary"),
                vmem_limit_bytes=vmem_limit,
            ),
        )(x, t)

    # loss_i = -logpt_i * tau - log(tau)/2 ; mean over M = N*H*W rows.
    # TODO(synk): alpha-weighting, normalized=True, and reduction in
    # {'sum','none'} are not wired; module defaults only.
    tau_f = jnp.asarray(tau, jnp.float32)
    total_logpt = jnp.sum(partials)
    return -tau_f * total_logpt / jnp.float32(M) - 0.5 * jnp.log(tau_f)


def mtl_loss_ref(logits_nchw, target, tau):
    """Pure-JAX reference of the PyTorch forward (defaults)."""
    N, C, H, W = logits_nchw.shape
    x = jnp.transpose(logits_nchw.reshape(N, C, H * W), (0, 2, 1)).reshape(-1, C)
    t = target.reshape(-1).astype(jnp.int32)
    logp = jax.nn.log_softmax(x.astype(jnp.float32), axis=-1)
    logpt = jnp.take_along_axis(logp, t[:, None], axis=1)[:, 0]
    tau_f = jnp.asarray(tau, jnp.float32)
    loss = -logpt * tau_f + (-jnp.log(tau_f)) / 2.0
    return loss.mean()


if __name__ == "__main__":
    root = jax.random.PRNGKey(0)
    tau = jnp.float32(0.7)

    def run_case(seed, n, c, h, w, dtype, *, rtol, atol, **kw):
        kx, kt = jax.random.split(jax.random.fold_in(root, seed))
        logits = jax.random.normal(kx, (n, c, h, w), dtype=jnp.float32).astype(dtype)
        target = jax.random.randint(kt, (n, h, w), 0, c, dtype=jnp.int32)
        out = jax.block_until_ready(mtl_loss(logits, target, tau, **kw))
        ref = jax.block_until_ready(mtl_loss_ref(logits, target, tau))
        assert jnp.allclose(out, ref, rtol=rtol, atol=atol), ((n, c, h, w), dtype, out, ref)

    # 1) Module-default small shape (fast path, single tile, f32).
    run_case(0, 2, 4, 16, 16, jnp.float32, rtol=1e-5, atol=1e-5)
    # 2) Same shape in bf16 (bf16 max/sub on the VPU, f32 exp/log).
    run_case(1, 2, 4, 16, 16, jnp.bfloat16, rtol=1e-2, atol=1e-2)
    # 3) N=1: spatial axis split into a second parallel axis (v7x dual-TC path).
    run_case(2, 1, 4, 64, 64, jnp.float32, rtol=1e-5, atol=1e-5,
             max_block_bytes=16 * 1024)
    # 4) Odd C, partial last tile + clamped padded grid step on the fast path.
    run_case(3, 1, 3, 20, 128, jnp.float32, rtol=1e-5, atol=1e-5,
             max_block_bytes=16 * 1024)
    # 5) L % 128 != 0 -> fallback lane-dense kernel with masked last tile.
    run_case(4, 2, 5, 10, 30, jnp.float32, rtol=1e-5, atol=1e-5,
             max_block_bytes=2560)

    print("KERNEL_OK")
</pallas_src>

<mosaic_0001>
module attributes {stable_mosaic.version = 11 : i64} {
  func.func @_mtl_kernel_rows(%arg0: i32, %arg1: i32, %arg2: i32, %arg3: memref<1x4x2x128xf32, #tpu.memory_space<vmem>>, %arg4: memref<1x1x2x128xi32, #tpu.memory_space<vmem>>, %arg5: memref<1x1x1x1xf32, #tpu.memory_space<vmem>>) attributes {dimension_semantics = [#tpu.dimension_semantics<parallel>, #tpu.dimension_semantics<parallel>, #tpu.dimension_semantics<arbitrary>], iteration_bounds = array<i64: 2, 1, 1>, scalar_prefetch = 0 : i64, scratch_operands = 0 : i64, tpu.core_type = #tpu.core_type<tc>, window_params = [{transform_indices = @transform_0, window_bounds = array<i64: 1, 4, 2, 128>}, {transform_indices = @transform_1, window_bounds = array<i64: 1, 1, 2, 128>}, {transform_indices = @transform_2, window_bounds = array<i64: 1, 1, 1, 1>}]} {
    %c0_i32 = arith.constant 0 : i32
    %0 = arith.cmpi eq, %arg2, %c0_i32 : i32
    %1 = arith.extui %0 : i1 to i32
    %c0_i32_0 = arith.constant 0 : i32
    %2 = arith.cmpi ne, %1, %c0_i32_0 : i32
    scf.if %2 {
      %cst_48 = arith.constant 0.000000e+00 : f32
      %68 = vector.broadcast %cst_48 : f32 to vector<1x1x1x1xf32>
      %c0_49 = arith.constant 0 : index
      %c0_50 = arith.constant 0 : index
      %c0_51 = arith.constant 0 : index
      %c0_52 = arith.constant 0 : index
      %69 = vector.load %arg5[%c0_49, %c0_50, %c0_51, %c0_52] : memref<1x1x1x1xf32, #tpu.memory_space<vmem>>, vector<1x1x1x1xf32>
      tpu.vector_store %arg5[%c0_49, %c0_50, %c0_51, %c0_52], %68 {strides = array<i32>} : memref<1x1x1x1xf32, #tpu.memory_space<vmem>>, vector<1x1x1x1xf32>,
    } else {
    }
    %c0 = arith.constant 0 : index
    %c0_1 = arith.constant 0 : index
    %c0_2 = arith.constant 0 : index
    %c0_3 = arith.constant 0 : index
    %3 = vector.load %arg4[%c0, %c0_1, %c0_2, %c0_3] : memref<1x1x2x128xi32, #tpu.memory_space<vmem>>, vector<1x1x2x128xi32>
    %4 = vector.shape_cast %3 : vector<1x1x2x128xi32> to vector<2x128xi32>
    %c0_4 = arith.constant 0 : index
    %c0_5 = arith.constant 0 : index
    %c0_6 = arith.constant 0 : index
    %c0_7 = arith.constant 0 : index
    %5 = vector.load %arg3[%c0_4, %c0_5, %c0_6, %c0_7] : memref<1x4x2x128xf32, #tpu.memory_space<vmem>>, vector<1x1x2x128xf32>
    %6 = vector.shape_cast %5 : vector<1x1x2x128xf32> to vector<2x128xf32>
    %c0_8 = arith.constant 0 : index
    %c1 = arith.constant 1 : index
    %c0_9 = arith.constant 0 : index
    %c0_10 = arith.constant 0 : index
    %7 = vector.load %arg3[%c0_8, %c1, %c0_9, %c0_10] : memref<1x4x2x128xf32, #tpu.memory_space<vmem>>, vector<1x1x2x128xf32>
    %8 = vector.shape_cast %7 : vector<1x1x2x128xf32> to vector<2x128xf32>
    %9 = arith.maximumf %6, %8 : vector<2x128xf32>
    %c0_11 = arith.constant 0 : index
    %c2 = arith.constant 2 : index
    %c0_12 = arith.constant 0 : index
    %c0_13 = arith.constant 0 : index
    %10 = vector.load %arg3[%c0_11, %c2, %c0_12, %c0_13] : memref<1x4x2x128xf32, #tpu.memory_space<vmem>>, vector<1x1x2x128xf32>
    %11 = vector.shape_cast %10 : vector<1x1x2x128xf32> to vector<2x128xf32>
    %12 = arith.maximumf %9, %11 : vector<2x128xf32>
    %c0_14 = arith.constant 0 : index
    %c3 = arith.constant 3 : index
    %c0_15 = arith.constant 0 : index
    %c0_16 = arith.constant 0 : index
    %13 = vector.load %arg3[%c0_14, %c3, %c0_15, %c0_16] : memref<1x4x2x128xf32, #tpu.memory_space<vmem>>, vector<1x1x2x128xf32>
    %14 = vector.shape_cast %13 : vector<1x1x2x128xf32> to vector<2x128xf32>
    %15 = arith.maximumf %12, %14 : vector<2x128xf32>
    %cst = arith.constant 0.000000e+00 : f32
    %16 = vector.broadcast %cst : f32 to vector<2x128xf32>
    %cst_17 = arith.constant 0.000000e+00 : f32
    %17 = vector.broadcast %cst_17 : f32 to vector<2x128xf32>
    %c0_18 = arith.constant 0 : index
    %c0_19 = arith.constant 0 : index
    %c0_20 = arith.constant 0 : index
    %c0_21 = arith.constant 0 : index
    %18 = vector.load %arg3[%c0_18, %c0_19, %c0_20, %c0_21] : memref<1x4x2x128xf32, #tpu.memory_space<vmem>>, vector<1x1x2x128xf32>
    %19 = vector.shape_cast %18 : vector<1x1x2x128xf32> to vector<2x128xf32>
    %20 = arith.subf %19, %15 : vector<2x128xf32>
    %21 = math.exp %20 : vector<2x128xf32>
    %22 = arith.addf %16, %21 : vector<2x128xf32>
    %c0_i32_22 = arith.constant 0 : i32
    %23 = vector.broadcast %c0_i32_22 : i32 to vector<2x128xi32>
    %24 = arith.cmpi eq, %4, %23 : vector<2x128xi32>
    %cst_23 = arith.constant 0.000000e+00 : f32
    %25 = vector.broadcast %cst_23 : f32 to vector<2x128xf32>
    %26 = arith.select %24, %20, %25 : vector<2x128xi1>, vector<2x128xf32>
    %27 = arith.addf %17, %26 : vector<2x128xf32>
    %c0_24 = arith.constant 0 : index
    %c1_25 = arith.constant 1 : index
    %c0_26 = arith.constant 0 : index
    %c0_27 = arith.constant 0 : index
    %28 = vector.load %arg3[%c0_24, %c1_25, %c0_26, %c0_27] : memref<1x4x2x128xf32, #tpu.memory_space<vmem>>, vector<1x1x2x128xf32>
    %29 = vector.shape_cast %28 : vector<1x1x2x128xf32> to vector<2x128xf32>
    %30 = arith.subf %29, %15 : vector<2x128xf32>
    %31 = math.exp %30 : vector<2x128xf32>
    %32 = arith.addf %22, %31 : vector<2x128xf32>
    %c1_i32 = arith.constant 1 : i32
    %33 = vector.broadcast %c1_i32 : i32 to vector<2x128xi32>
    %34 = arith.cmpi eq, %4, %33 : vector<2x128xi32>
    %cst_28 = arith.constant 0.000000e+00 : f32
    %35 = vector.broadcast %cst_28 : f32 to vector<2x128xf32>
    %36 = arith.select %34, %30, %35 : vector<2x128xi1>, vector<2x128xf32>
    %37 = arith.addf %27, %36 : vector<2x128xf32>
    %c0_29 = arith.constant 0 : index
    %c2_30 = arith.constant 2 : index
    %c0_31 = arith.constant 0 : index
    %c0_32 = arith.constant 0 : index
    %38 = vector.load %arg3[%c0_29, %c2_30, %c0_31, %c0_32] : memref<1x4x2x128xf32, #tpu.memory_space<vmem>>, vector<1x1x2x128xf32>
    %39 = vector.shape_cast %38 : vector<1x1x2x128xf32> to vector<2x128xf32>
    %40 = arith.subf %39, %15 : vector<2x128xf32>
    %41 = math.exp %40 : vector<2x128xf32>
    %42 = arith.addf %32, %41 : vector<2x128xf32>
    %c2_i32 = arith.constant 2 : i32
    %43 = vector.broadcast %c2_i32 : i32 to vector<2x128xi32>
    %44 = arith.cmpi eq, %4, %43 : vector<2x128xi32>
    %cst_33 = arith.constant 0.000000e+00 : f32
    %45 = vector.broadcast %cst_33 : f32 to vector<2x128xf32>
    %46 = arith.select %44, %40, %45 : vector<2x128xi1>, vector<2x128xf32>
    %47 = arith.addf %37, %46 : vector<2x128xf32>
    %c0_34 = arith.constant 0 : index
    %c3_35 = arith.constant 3 : index
    %c0_36 = arith.constant 0 : index
    %c0_37 = arith.constant 0 : index
    %48 = vector.load %arg3[%c0_34, %c3_35, %c0_36, %c0_37] : memref<1x4x2x128xf32, #tpu.memory_space<vmem>>, vector<1x1x2x128xf32>
    %49 = vector.shape_cast %48 : vector<1x1x2x128xf32> to vector<2x128xf32>
    %50 = arith.subf %49, %15 : vector<2x128xf32>
    %51 = math.exp %50 : vector<2x128xf32>
    %52 = arith.addf %42, %51 : vector<2x128xf32>
    %c3_i32 = arith.constant 3 : i32
    %53 = vector.broadcast %c3_i32 : i32 to vector<2x128xi32>
    %54 = arith.cmpi eq, %4, %53 : vector<2x128xi32>
    %cst_38 = arith.constant 0.000000e+00 : f32
    %55 = vector.broadcast %cst_38 : f32 to vector<2x128xf32>
    %56 = arith.select %54, %50, %55 : vector<2x128xi1>, vector<2x128xf32>
    %57 = arith.addf %47, %56 : vector<2x128xf32>
    %58 = math.log %52 : vector<2x128xf32>
    %59 = arith.subf %57, %58 : vector<2x128xf32>
    %c0_39 = arith.constant 0 : index
    %c0_40 = arith.constant 0 : index
    %c0_41 = arith.constant 0 : index
    %c0_42 = arith.constant 0 : index
    %60 = vector.load %arg5[%c0_39, %c0_40, %c0_41, %c0_42] : memref<1x1x1x1xf32, #tpu.memory_space<vmem>>, vector<1x1x1x1xf32>
    %61 = vector.shape_cast %59 : vector<2x128xf32> to vector<1x2x128xf32>
    %cst_43 = arith.constant dense<0.000000e+00> : vector<1xf32>
    %62 = vector.multi_reduction <add>, %61, %cst_43 [1, 2] : vector<1x2x128xf32> to vector<1xf32>
    %63 = vector.shape_cast %62 : vector<1xf32> to vector<1x1x1xf32>
    %64 = vector.extract %63[0, 0, 0] : f32 from vector<1x1x1xf32>
    %65 = vector.broadcast %64 : f32 to vector<1x1x1x1xf32>
    %66 = arith.addf %60, %65 : vector<1x1x1x1xf32>
    %c0_44 = arith.constant 0 : index
    %c0_45 = arith.constant 0 : index
    %c0_46 = arith.constant 0 : index
    %c0_47 = arith.constant 0 : index
    %67 = vector.load %arg5[%c0_44, %c0_45, %c0_46, %c0_47] : memref<1x1x1x1xf32, #tpu.memory_space<vmem>>, vector<1x1x1x1xf32>
    tpu.vector_store %arg5[%c0_44, %c0_45, %c0_46, %c0_47], %66 {strides = array<i32>} : memref<1x1x1x1xf32, #tpu.memory_space<vmem>>, vector<1x1x1x1xf32>,
    return
  }
  func.func @transform_0(%arg0: i32, %arg1: i32, %arg2: i32) -> (i32, i32, i32, i32) {
    %c1_i32 = arith.constant 1 : i32
    %0 = arith.muli %arg1, %c1_i32 : i32
    %1 = arith.addi %0, %arg2 : i32
    %c0_i32 = arith.constant 0 : i32
    %2 = arith.minsi %1, %c0_i32 : i32
    %c0_i32_0 = arith.constant 0 : i32
    %c0_i32_1 = arith.constant 0 : i32
    %c0_i32_2 = arith.constant 0 : i32
    return %arg0, %c0_i32_0, %2, %c0_i32_1 : i32, i32, i32, i32
  }
  func.func @transform_1(%arg0: i32, %arg1: i32, %arg2: i32) -> (i32, i32, i32, i32) {
    %c1_i32 = arith.constant 1 : i32
    %0 = arith.muli %arg1, %c1_i32 : i32
    %1 = arith.addi %0, %arg2 : i32
    %c0_i32 = arith.constant 0 : i32
    %2 = arith.minsi %1, %c0_i32 : i32
    %c0_i32_0 = arith.constant 0 : i32
    %c0_i32_1 = arith.constant 0 : i32
    %c0_i32_2 = arith.constant 0 : i32
    return %arg0, %c0_i32_0, %2, %c0_i32_1 : i32, i32, i32, i32
  }
  func.func @transform_2(%arg0: i32, %arg1: i32, %arg2: i32) -> (i32, i32, i32, i32) {
    %c0_i32 = arith.constant 0 : i32
    %c0_i32_0 = arith.constant 0 : i32
    %c0_i32_1 = arith.constant 0 : i32
    return %arg0, %arg1, %c0_i32, %c0_i32_0 : i32, i32, i32, i32
  }
}

</mosaic_0001>

<bundles_post_ra>
// kernel: tpu_custom_call.1
= control target key start
LH: loop header
LB: loop body
LE: loop exit
PB: predicated region body
PF: predicated region fallthrough
CT: control target
= control target key end

     0   :  { %7 = vsyncpa [#allocation3], 0  ;;  %s819_s0 = inlined_call_operand.hbm [shape: f32[2,4,2,128], index: 0, kind: input, shape index: {}]   ;;  %s820_s1 = inlined_call_operand.hbm [shape: s32[2,1,2,128], index: 1, kind: input, shape index: {}]   ;;  %s821_s2 = inlined_call_operand.vmem [shape: f32[2,1,1,1], index: 2, kind: output, shape index: {}]  }
   0x1   :  { %9 = vsyncpa [#allocation3 + $0x1], 0 }
   0x2   :  { %10 = vsyncpa [#allocation5], 0 }
   0x3   :  { %12 = vsyncpa [#allocation5 + $0x1], 0  ;;  %s653_s9 = smov 0   ;;  %s655_s10 = smov 0  }
   0x4   :  { %s657_s11 = smov 0   ;;  %s659_s12 = smov 0  }
   0x5   :  { %s661_s13 = smov 0   ;;  %s663_s14 = smov 0  }
   0x6 LB: > { %s424_s15 = sadd.s32 4294967295, %s631_s14   ;;  %s37_s16 = sadd.s32 1, %s627_s13  ;;  %s631_s14 = sphi %s663_s14, %s18_s14   ;;  %s627_s13 = sphi %s661_s13, %s833_s13   ;;  %s623_s12 = sphi %s659_s12, %s832_s12   ;;  %s619_s11 = sphi %s657_s11, %s831_s11   ;;  %s615_s10 = sphi %s655_s10, %s830_s10   ;;  %s611_s9 = sphi %s653_s9, %s829_s9  }
   0x7   : > { %p39_p0 = scmp.ge.s32.totalorder %s37_s16, 2  ;;  %s52_s17 = sadd.s32 1, %s619_s11 }
   0x8   : > { %p59_p1 = scmp.ne.s32.totalorder %s619_s11, %s615_s10  ;;  %p60_p2 = scmp.eq.s32.totalorder %s631_s14, 0 }
   0x9   : > { %s835_s16 = smov (%p39_p0, %s37_s16), 0  ;;  %p65_p4 = scmp.ne.s32.totalorder %s615_s10, %s611_s9 }
   0xa   : > { %p689_p3 = por %p60_p2, %p59_p1  ;;  %s47_s19 = ssub.s32 %s627_s13, %s835_s16 }
   0xb   : > { %p66_p5 = scmp.eq.s32.totalorder %s424_s15, 0  ;;  %p50_p6 = scmp.eq.s32.totalorder %s47_s19, 0 }
   0xc   : > { %p455_p8 = scmp.lt.s32.totalorder %s631_s14, 2  ;;  %s705_s22 = sand.u32 1, %s619_s11  }
   0xd   : > { %p696_p7 = por %p66_p5, %p65_p4  ;;  %s441_s23 = sshll.u32 %s627_s13, 7 }
   0xe   : > { %s702_s21 = scalar_select %p50_p6, %s619_s11, %s52_s17  }
   0xf   : > { %s824_s20 = scalar_select %p696_p7, 1, 0 }
  0x10   : > { %s428_s24 = sshll.u32 %s705_s22, 3  ;;  %s712_s27 = scalar_lea.hbm %s819_s0, %s441_s23 }
  0x11   : > { %s155_s28 = scalar_lea.vmem [#allocation2], %s428_s24  ;;  %p716_p9 = pnand %p455_p8, %p689_p3 }
  0x12   : > { %s166_s29 = sshll.u32 %s155_s28, 4  ;;  %s152_s3 = scalar_lea.sflag [#allocation3], %s705_s22  ;;  %s720_s29 = int_to_ptr.vmem [resolvable:$true] %s166_s29 }
  0x13   : > { %s517_s4 = scalar_lea.hbm %s712_s27, 128  ;;  %p519_p11 = pneg %p716_p9 }
  0x14   : > { %p518_p10 = scmp.ne.s32.totalorder %s712_s27, %s517_s4  ;;  %s522_s7 = scalar_lea.hbm %s819_s0, 256 }
  0x15   : > { %p523_p0 = scmp.lt.u32.totalorder %s712_s27, %s819_s0  ;;  %p524_p1 = scmp.lt.u32.totalorder %s522_s7, %s517_s4 }
  0x16   : > { %p520_p12 = pnand %p519_p11, %p518_p10  ;;  %p526_p3 = scmp.lt.u32.totalorder %s517_s4, %s712_s27 }
  0x17   : > { %p525_p2 = por %p524_p1, %p523_p0 }
  0x18   : > { %p521_p13 = pneg %p520_p12 }
  0x19   : > { %p527_p4 = por %p526_p3, %p525_p2 }
  0x1b   : > { %p528_p5 = pnand %p527_p4, %p521_p13 }
  0x1d   : > { %531 = shalt.err (!%p528_p5)
}
  0x1e   : > { %s532_s15 = scalar_lea.vmem %s720_s29, 128  ;;  %s633_s17 = smov [#allocation2]  }
  0x1f   : > { %p533_p6 = scmp.ne.s32.totalorder %s720_s29, %s532_s15  ;;  %s537_s18 = sshll.u32 %s633_s17, 4  ;;  %s538_s18 = int_to_ptr.vmem [resolvable:$false] %s537_s18 }
  0x20   : > { %s539_s19 = scalar_lea.vmem %s538_s18, 256  ;;  %p540_p12 = scmp.lt.s32.totalorder %s720_s29, %s538_s18 }
  0x21   : > { %p535_p8 = pnand %p533_p6, %p519_p11  ;;  %p541_p0 = scmp.lt.s32.totalorder %s539_s19, %s532_s15 }
  0x23   : > { %p536_p10 = pneg %p535_p8  ;;  %p542_p1 = por %p541_p0, %p540_p12 }
  0x25   : > { %p543_p2 = pnand %p542_p1, %p536_p10 }
  0x27   : > { %546 = shalt.err (!%p543_p2)
}
  0x28   : > { %s634_s23 = smov 32   ;;  %s635_s24 = smov 2  }
  0x29   : > { %451 = dma.hbm_to_vmem [thread:$0]  (!%p716_p9), %s712_s27, 128, %s720_s29, %s152_s3, %s634_s23, %s634_s23, %s635_s24  }
  0x2a   : > { %p433_p13 = scmp.ge.s32.totalorder %s631_s14, 1  ;;  %p196_p3 = scmp.lt.s32.totalorder %s631_s14, 3 }
  0x2b   : > { %s431_s25 = sshll.u32 %s705_s22, 1  ;;  %s432_s28 = sshll.u32 %s627_s13, 5 }
  0x2c   : > { %p753_p4 = pnand %p433_p13, %p196_p3  ;;  %s180_s4 = scalar_lea.vmem [#allocation4], %s431_s25 }
  0x2d   : > { %s191_s5 = sshll.u32 %s180_s4, 4  ;;  %s761_s8 = scalar_lea.hbm %s820_s1, %s432_s28  ;;  %s192_s5 = int_to_ptr.vmem [resolvable:$true] %s191_s5 }
  0x2e   : > { %s826_s26 = scalar_select %p753_p4, 1, 0 }
  0x2f   : > { %s177_s27 = scalar_lea.sflag [#allocation5], %s705_s22  ;;  %s547_s29 = scalar_lea.hbm %s761_s8, 32 }
  0x30   : > { %p548_p5 = scmp.ne.s32.totalorder %s761_s8, %s547_s29  ;;  %s552_s15 = scalar_lea.hbm %s820_s1, 64 }
  0x31   : > { %p553_p10 = scmp.lt.u32.totalorder %s761_s8, %s820_s1  ;;  %p554_p12 = scmp.lt.u32.totalorder %s552_s15, %s547_s29 }
  0x32   : > { %p550_p6 = pnand %p548_p5, %p519_p11  ;;  %p556_p1 = scmp.lt.u32.totalorder %s547_s29, %s761_s8 }
  0x33   : > { %p555_p0 = por %p554_p12, %p553_p10 }
  0x34   : > { %p551_p8 = pneg %p550_p6 }
  0x35   : > { %p557_p2 = por %p556_p1, %p555_p0 }
  0x37   : > { %p558_p13 = pnand %p557_p2, %p551_p8 }
  0x39   : > { %561 = shalt.err (!%p558_p13)
}
  0x3a   : > { %s562_s22 = scalar_lea.vmem %s192_s5, 32  ;;  %s636_s19 = smov [#allocation4]  }
  0x3b   : > { %p563_p3 = scmp.ne.s32.totalorder %s192_s5, %s562_s22  ;;  %s567_s23 = sshll.u32 %s636_s19, 4  ;;  %s568_s23 = int_to_ptr.vmem [resolvable:$false] %s567_s23 }
  0x3c   : > { %s569_s24 = scalar_lea.vmem %s568_s23, 64  ;;  %p570_p7 = scmp.lt.s32.totalorder %s192_s5, %s568_s23 }
  0x3d   : > { %p565_p5 = pnand %p563_p3, %p519_p11  ;;  %p571_p4 = scmp.lt.s32.totalorder %s569_s24, %s562_s22 }
  0x3f   : > { %p566_p6 = pneg %p565_p5  ;;  %p572_p10 = por %p571_p4, %p570_p7 }
  0x41   : > { %p573_p12 = pnand %p572_p10, %p566_p6 }
  0x43   : > { %576 = shalt.err (!%p573_p12)
}
  0x44   : > { %454 = dma.hbm_to_vmem [thread:$0]  (!%p716_p9), %s761_s8, 32, %s192_s5, %s177_s27  }
  0x45   : > { %p827_p8 = scmp.ne.s32.totalorder %s826_s26, 0 }
  0x46   : > { %s202_s25 = sand.u32 (!%p827_p8), 1, %s615_s10   ;;  %p828_p11 = scmp.ne.s32.totalorder (!%p827_p8), %s824_s20, 0 }
  0x47   : > { %200 = sbr.rel (%p827_p8) target bundleno = 335 (0x14f), region = 28  ;;  %s434_s28 = sshll.u32 (!%p827_p8), %s202_s25, 3 }
  0x48   : > { %s203_s4 = scalar_lea.sflag (!%p827_p8), [#allocation3], %s202_s25  ;;  %s206_s6 = scalar_lea.vmem (!%p827_p8), [#allocation2], %s434_s28 }
  0x4e   : > { %602 = dma.done.wait (%p828_p11), %s203_s4, 128  }
  0x4f   : > { %604 = vsyncadd (%p828_p11), %s203_s4, 4294967168  ;;  %s435_s7 = sshll.u32 %s202_s25, 1  ;;  %s212_s29 = scalar_lea.sflag [#allocation5], %s202_s25 }
  0x50   : > { %s215_s30 = scalar_lea.vmem [#allocation4], %s435_s7 }
  0x51   : > { %606 = dma.done.wait (%p828_p11), %s212_s29, 32  }
  0x52   : > { %608 = vsyncadd (%p828_p11), %s212_s29, 4294967264  ;;  %v261_v0 = vld [vmem:[%s206_s6] sm:$0x3]  ;;  %v436_v1 = vld [vmem:[%s206_s6 + $0x2] sm:$0x3]  ;;  %vm303_vm4 = vcmask 1041408  }
  0x53   : > { %v264_v2 = vmax.f32 %v261_v0, %v436_v1  ;;  %v437_v3 = vld [vmem:[%s206_s6 + $0x4] sm:$0x3]  ;;  %v438_v4 = vld [vmem:[%s206_s6 + $0x6] sm:$0x3]  ;;  %v260_v16 = vld [vmem:[%s215_s30] sm:$0x3] }
  0x54   : > { %vm275_vm0 = vcmp.eq.s32.totalorder %v260_v16, 0  ;;  %vm282_vm1 = vcmp.eq.s32.totalorder %v260_v16, 1  ;;  %vm289_vm2 = vcmp.eq.s32.totalorder %v260_v16, 2  ;;  %vm296_vm3 = vcmp.eq.s32.totalorder %v260_v16, 3  ;;  %p248_p7 = scmp.lt.s32.totalorder %s623_s12, 1 }
  0x55   : > { %v267_v5 = vmax.f32 %v264_v2, %v437_v3  ;;  %vm258_vm5 = vcmask 0   ;;  %v637_v34 = vmov 0.0  }
  0x56   : > { %s837_s12 = smov (!%p248_p7, %s623_s12), 1 }
  0x57   : > { %v270_v6 = vmax.f32 %v267_v5, %v438_v4  ;;  %s253_s5 = scalar_lea.vmem %s821_s2, %s837_s12 }
  0x58   : > { %259 = vst.msk [vmem:[%s253_s5] sm:$0x1] %vm258_vm5, %v637_v34 }
  0x59   : > { %v271_v7 = vsub.f32 %v261_v0, %v270_v6  ;;  %v278_v8 = vsub.f32 %v436_v1, %v270_v6  ;;  %v285_v9 = vsub.f32 %v437_v3, %v270_v6  ;;  %v292_v10 = vsub.f32 %v438_v4, %v270_v6 }
  0x5b   : > { %v272_v11 = vmul.f32 1.442695, %v271_v7  ;;  %v279_v12 = vmul.f32 1.442695, %v278_v8  ;;  %v286_v13 = vmul.f32 1.442695, %v285_v9 }
  0x5c   : > { %v293_v14 = vmul.f32 1.442695, %v292_v10  ;;  %v276_v22 = vsel %vm275_vm0, %v271_v7, 0.0  ;;  %v283_v23 = vsel %vm282_vm1, %v278_v8, 0.0  ;;  %v290_v26 = vsel %vm289_vm2, %v285_v9, 0.0 }
  0x5d   : > { %507 = vpow2.f32 %v272_v11  ;;  %v284_v25 = vadd.f32 %v283_v23, %v276_v22  ;;  %v297_v28 = vsel %vm296_vm3, %v292_v10, 0.0 }
  0x5e   : > { %509 = vpow2.f32 %v279_v12 }
  0x5f   : > { %511 = vpow2.f32 %v286_v13  ;;  %v291_v27 = vadd.f32 %v290_v26, %v284_v25  ;;  %v302_v42 = vld [vmem:[%s253_s5] sm:$0x1] }
  0x60   : > { %513 = vpow2.f32 %v293_v14 }
  0x61   : > { %v298_v29 = vadd.f32 %v297_v28, %v291_v27 }
  0x67   : > { %v508_v15 = vpop.eup %507 }
  0x68   : > { %v510_v17 = vpop.eup %509 }
  0x69   : > { %v512_v18 = vpop.eup %511  ;;  %v281_v19 = vadd.f32 %v510_v17, %v508_v15 }
  0x6a   : > { %v514_v20 = vpop.eup %513 }
  0x6b   : > { %v288_v21 = vadd.f32 %v512_v18, %v281_v19 }
  0x6d   : > { %v295_v24 = vadd.f32 %v514_v20, %v288_v21 }
  0x6f   : > { %515 = vlog2.f32 %v295_v24 }
  0x79   : > { %v516_v30 = vpop.eup %515 }
  0x7a   : > { %v300_v31 = vmul.f32 0.6931472, %v516_v30 }
  0x7c   : > { %v301_v32 = vsub.f32 %v298_v29, %v300_v31 }
  0x7e   : > { %v304_v33 = vsel %vm303_vm4, %v301_v32, 0.0 }
  0x7f   : > { %305 = vadd.xlane.f32.xlu0 %v304_v33 }
 0x10c   : > { %v306_v35 = vpop.xlane.xlu0 %305 }
 0x10d   : > { %v307_v36 = vrot.slane %v306_v35, 4 }
 0x10f   : > { %v308_v37 = vadd.f32 %v307_v36, %v306_v35 }
 0x111   : > { %v309_v38 = vrot.slane %v308_v37, 2 }
 0x113   : > { %v310_v39 = vadd.f32 %v309_v38, %v308_v37 }
 0x115   : > { %v311_v40 = vrot.slane %v310_v39, 1 }
 0x117   : > { %v312_v41 = vadd.f32 %v311_v40, %v310_v39 }
 0x119   : > { %442 = vpush %v312_v41 }
 0x14a   : > { %s443_s8 = spop %442 }
 0x14b   : > { %v314_v43 = vstv %s443_s8 }
 0x14c   : > { %v315_v44 = vadd.f32 %v314_v43, %v302_v42 }
 0x14e   : > { %317 = vst.msk [vmem:[%s253_s5] sm:$0x1] %vm258_vm5, %v315_v44 }
 0x14f PF: > { %s18_s14 = sadd.s32 1, %s631_s14   ;;  %s829_s9 = smov %s615_s10 }
 0x150   : > { %p15_p9 = scmp.ge.s32.totalorder %s18_s14, 4   ;;  %s830_s10 = smov %s619_s11 }
 0x151   : > { %s831_s11 = smov %s702_s21  ;;  %s832_s12 = smov %s627_s13 }
 0x152   : > { %s833_s13 = smov %s835_s16  ;;  %17 = sbr.rel (!%p15_p9) target bundleno = 6 (0x6), region = 88 }
 0x159   :  { %341 = vsyncpa [#allocation3], 1 }
 0x15a   :  { %343 = vsyncpa [#allocation3 + $0x1], 1 }
 0x15b   :  { %344 = vsyncpa [#allocation5], 1 }
 0x15c   :  { %346 = vsyncpa [#allocation5 + $0x1], 1 }

</bundles_post_ra>
